<compile_context>
chip_gen: v7x
topology: tpu7x:2x2x1
jax: 0.10.0
libtpu: 0.0.40
codegen_flags: <defaults>
</compile_context>

<pallas_src>
import functools

import jax
import jax.numpy as jnp
from jax.experimental import pallas as pl
from jax.experimental.pallas import tpu as pltpu


def _round_up(x, m):
    return ((x + m - 1) // m) * m


def _cdiv(a, b):
    return (a + b - 1) // b


# ---------------------------------------------------------------------------
# Pallas kernel: whole MixNet forward hot path for one batch tile.
# ---------------------------------------------------------------------------
def mixnet_kernel(
    x_ref,      # (TB, S)     flattened state block (caller dtype; cast in-kernel)
    q_ref,      # (TB, A)     per-agent Q values (f32)
    w_ref,      # (S, Wpad)   fused hyper weights [W1 agent-major | Wb1 | W2 | Wb2a | 0]
    b_ref,      # (1, Wpad)   fused hyper biases (f32)
    e_ref,      # (A, A*H)    0/1 agent->lane expansion matrix (f32)
    wb2b_ref,   # (1, H)      hyper_bias_2[2] weight as a row (f32)
    bb2b_ref,   # (1, 1)      hyper_bias_2[2] bias (SMEM scalar, f32)
    out_ref,    # (TB, 1)     Q_tot
    *,
    hidden_dim,
    n_agents,
    compute_dtype,
):
    H, A = hidden_dim, n_agents
    AH = A * H

    x = x_ref[...].astype(compute_dtype)              # (TB, S)
    q = q_ref[...]                                     # (TB, A) f32

    # --- one fused MXU pass over all four hyper nets -------------------------
    big = (
        jnp.dot(x, w_ref[...], preferred_element_type=jnp.float32) + b_ref[...]
    )                                                  # (TB, Wpad) f32
    hw1 = jnp.abs(big[:, 0:AH])                        # (TB, A*H)  |hyper_weight_1|
    hb1 = big[:, AH:AH + H]                            # (TB, H)    hyper_bias_1
    hw2 = jnp.abs(big[:, AH + H:AH + 2 * H])           # (TB, H)    |hyper_weight_2|
    hb2h = jnp.maximum(big[:, AH + 2 * H:AH + 3 * H], 0.0)   # relu(hyper_bias_2[0])

    # --- mixing layer 1: bmm(weight_1.view(B,H,A), q) + bias_1 ---------------
    # q expanded to agent-major lanes on the (idle) MXU, then ONE full-width
    # VPU multiply; fold the A agent groups with static slice-adds.
    qexp = jnp.dot(q, e_ref[...], preferred_element_type=jnp.float32)  # (TB, A*H)
    prod = hw1 * qexp                                  # (TB, A*H) full-width VPU

    mixed = hb1
    for a in range(A):                                 # static unroll
        mixed = mixed + prod[:, a * H:(a + 1) * H]
    mixed = jnp.maximum(mixed, 0.0)                    # relu

    # --- mixing layer 2 + hyper_bias_2[2] fused into one lane reduce ---------
    z = hw2 * mixed + hb2h * wb2b_ref[...]             # (TB, H)
    out = jnp.sum(z, axis=1, keepdims=True) + bb2b_ref[0, 0]
    out_ref[...] = out.astype(out_ref.dtype)


# ---------------------------------------------------------------------------
# Parameter init (PyTorch-Linear-style), weights stored as (in, out).
# ---------------------------------------------------------------------------
def init_mixnet_params(key, state_size, n_agents, hidden_dim):
    def linear(k, fan_in, fan_out):
        kw, kb = jax.random.split(k)
        bound = 1.0 / jnp.sqrt(fan_in)
        w = jax.random.uniform(kw, (fan_in, fan_out), jnp.float32, -bound, bound)
        b = jax.random.uniform(kb, (1, fan_out), jnp.float32, -bound, bound)
        return w, b

    k1, k2, k3, k4, k5 = jax.random.split(key, 5)
    p = {}
    p["w1"], p["b1"] = linear(k1, state_size, n_agents * hidden_dim)      # hyper_net_weight_1
    p["wb1"], p["bb1"] = linear(k2, state_size, hidden_dim)               # hyper_net_bias_1
    p["w2"], p["b2"] = linear(k3, state_size, hidden_dim)                 # hyper_net_weight_2
    p["wb2a"], p["bb2a"] = linear(k4, state_size, hidden_dim)             # hyper_net_bias_2[0]
    p["wb2b"], p["bb2b"] = linear(k5, hidden_dim, 1)                      # hyper_net_bias_2[2]
    return p


def _prepare_params(params, n_agents, hidden_dim, compute_dtype):
    """Permute W1 columns to agent-major, fuse ALL hyper nets into one weight
    (columns zero-padded to a multiple of 128), build the 0/1 agent-expansion
    matrix, transpose wb2b to a row. Biases stay f32; weights use compute_dtype."""
    A, H = n_agents, hidden_dim
    AH = A * H
    idx = jnp.arange(AH)
    perm = (idx % H) * A + (idx // H)          # new col a*H + h  <-  old col h*A + a
    w1p = params["w1"][:, perm]
    b1p = params["b1"][:, perm]
    wfused = jnp.concatenate([w1p, params["wb1"], params["w2"], params["wb2a"]], axis=1)
    bfused = jnp.concatenate([b1p, params["bb1"], params["b2"], params["bb2a"]], axis=1)
    width = AH + 3 * H
    wpad = _round_up(width, 128)
    if wpad != width:
        wfused = jnp.pad(wfused, ((0, 0), (0, wpad - width)))
        bfused = jnp.pad(bfused, ((0, 0), (0, wpad - width)))
    expand = jnp.repeat(jnp.eye(A, dtype=jnp.float32), H, axis=1)   # (A, A*H) 0/1
    return dict(
        wfused=wfused.astype(compute_dtype),
        bfused=bfused.astype(jnp.float32),
        expand=expand,
        wb2b_row=params["wb2b"].T.astype(jnp.float32),    # (1, H)
        bb2b=params["bb2b"].astype(jnp.float32),          # (1, 1) -> SMEM scalar
    ), wpad


# ---------------------------------------------------------------------------
# Wrapper: ragged batch tiling (no padding copies), pallas_call.
# ---------------------------------------------------------------------------
def mixnet_forward(
    q_values,
    observations,
    hidden,
    params,
    *,
    hidden_dim,
    compute_dtype=jnp.bfloat16,   # weights + in-kernel matmul operand dtype
    batch_tile=1024,
):
    B, n_agents, obs_size = observations.shape
    A, H = n_agents, hidden_dim
    S = A * obs_size
    AH = A * H
    assert q_values.shape == (B, A)

    # Free reshape; x is streamed at the caller's dtype (no HBM copies here).
    x = observations.reshape(B, S)
    q = q_values.astype(jnp.float32)

    prepared, wpad = _prepare_params(params, A, H, compute_dtype)

    # Batch tile: large (amortize per-step overhead), multiple of 32 sublanes
    # (covers f32/bf16 tiling), capped so the grid has >= 2 steps where possible
    # (v7x dual-TC). Last block may be ragged: OOB rows read garbage, their
    # output rows are masked on write; rows are independent so this is safe.
    TB = min(_round_up(batch_tile, 32), max(32, _round_up(_cdiv(B, 2), 32)))
    grid = (_cdiv(B, TB),)

    kernel = functools.partial(
        mixnet_kernel, hidden_dim=H, n_agents=A, compute_dtype=compute_dtype)

    const = lambda i: (0, 0)   # weights: VMEM-resident, DMA'd once (index literally constant)
    in_specs = [
        pl.BlockSpec((TB, S), lambda i: (i, 0)),                  # x  (streamed)
        pl.BlockSpec((TB, A), lambda i: (i, 0)),                  # q  (streamed, f32)
        pl.BlockSpec((S, wpad), const),                           # fused hyper weights
        pl.BlockSpec((1, wpad), const),                           # fused hyper biases
        pl.BlockSpec((A, AH), const),                             # agent-expansion matrix
        pl.BlockSpec((1, H), const),                              # wb2b row
        pl.BlockSpec(memory_space=pltpu.MemorySpace.SMEM),        # bb2b scalar
    ]
    out_specs = pl.BlockSpec((TB, 1), lambda i: (i, 0))

    x_item = jnp.dtype(observations.dtype).itemsize
    w_item = jnp.dtype(compute_dtype).itemsize
    flops = 2 * B * S * wpad + 2 * B * A * AH + 12 * B * AH
    bytes_accessed = (
        B * S * x_item + B * A * 4                      # streamed x, q
        + S * wpad * w_item + A * AH * 4                # fused weights + expansion
        + (wpad + H + 1) * 4                            # biases + wb2b row + bb2b
        + B * 4                                         # out
    )

    out = pl.pallas_call(
        kernel,
        out_shape=jax.ShapeDtypeStruct((B, 1), jnp.float32),
        grid=grid,
        in_specs=in_specs,
        out_specs=out_specs,
        compiler_params=pltpu.CompilerParams(
            dimension_semantics=("parallel",),
            vmem_limit_bytes=32 * 1024 * 1024,
        ),
        cost_estimate=pl.CostEstimate(
            flops=int(flops), transcendentals=0, bytes_accessed=int(bytes_accessed)
        ),
    )(x, q, prepared["wfused"], prepared["bfused"], prepared["expand"],
      prepared["wb2b_row"], prepared["bb2b"])

    # hidden passes through unchanged in the non-recurrent path.
    return out, hidden


# ---------------------------------------------------------------------------
# Pure-JAX reference (PyTorch semantics), explicit HIGHEST matmul precision so
# the f32 comparison is not polluted by XLA's default bf16 dot behavior.
# ---------------------------------------------------------------------------
def mixnet_reference(q_values, observations, hidden, params, *, hidden_dim,
                     compute_dtype=jnp.bfloat16):
    hp = jax.lax.Precision.HIGHEST
    B, n_agents, obs_size = observations.shape
    x = observations.reshape(B, n_agents * obs_size).astype(compute_dtype)

    def lin(w, b):
        return jnp.dot(x, w.astype(compute_dtype),
                       preferred_element_type=jnp.float32, precision=hp) + b

    w1 = jnp.abs(lin(params["w1"], params["b1"])).reshape(B, hidden_dim, n_agents)
    b1 = lin(params["wb1"], params["bb1"])[..., None]                  # (B, H, 1)
    w2 = jnp.abs(lin(params["w2"], params["b2"]))                      # (B, H)
    h2 = jnp.maximum(lin(params["wb2a"], params["bb2a"]), 0.0)         # (B, H)
    b2 = jnp.dot(h2, params["wb2b"], precision=hp) + params["bb2b"]    # (B, 1)
    y = jnp.einsum("bhn,bn->bh", w1, q_values.astype(jnp.float32),
                   precision=hp)[..., None] + b1
    y = jnp.maximum(y, 0.0)
    y = jnp.sum(w2[..., None] * y, axis=1) + b2                        # (B, 1)
    return y, hidden


if __name__ == "__main__":
    # Shapes consistent with the module: n_agents observation spaces of obs_size.
    B, n_agents, obs_size = 2, 4, 16
    hidden_dim, hx_size = 32, 64
    state_size = n_agents * obs_size

    key = jax.random.PRNGKey(0)
    k_obs, k_q, k_params, k_obs2, k_q2 = jax.random.split(key, 5)

    observations = jax.random.normal(k_obs, (B, n_agents, obs_size), jnp.float32)
    q_values = jax.random.normal(k_q, (B, n_agents), jnp.float32)
    hidden = jnp.zeros((B, hx_size), jnp.float32)   # MixNet.init_hidden
    params = init_mixnet_params(k_params, state_size, n_agents, hidden_dim)

    # --- f32 path (tiny batch -> one ragged 32-row tile, rows 2..31 masked) --
    out, hidden_out = mixnet_forward(
        q_values, observations, hidden, params,
        hidden_dim=hidden_dim, compute_dtype=jnp.float32,
    )
    out = jax.block_until_ready(out)
    ref_out, _ = mixnet_reference(
        q_values, observations, hidden, params,
        hidden_dim=hidden_dim, compute_dtype=jnp.float32,
    )
    assert out.shape == (B, 1)
    assert hidden_out.shape == (B, hx_size)
    assert bool(jnp.isfinite(out).all())
    assert jnp.allclose(out, ref_out, atol=1e-3, rtol=1e-3), (out, ref_out)

    # --- default bf16 path: bf16 observations + bf16 weights, f32 accumulate --
    obs_bf = observations.astype(jnp.bfloat16)
    out_bf, _ = mixnet_forward(q_values, obs_bf, hidden, params, hidden_dim=hidden_dim)
    out_bf = jax.block_until_ready(out_bf)
    ref_bf, _ = mixnet_reference(q_values, obs_bf, hidden, params, hidden_dim=hidden_dim)
    assert bool(jnp.isfinite(out_bf).all())
    assert jnp.allclose(out_bf, ref_bf, atol=1e-2, rtol=1e-2), (out_bf, ref_bf)

    # --- larger batch: ragged multi-step grid, no wrapper-side padding --------
    B2 = 300
    obs2 = jax.random.normal(k_obs2, (B2, n_agents, obs_size), jnp.float32)
    q2 = jax.random.normal(k_q2, (B2, n_agents), jnp.float32)
    hid2 = jnp.zeros((B2, hx_size), jnp.float32)
    ref2, _ = mixnet_reference(q2, obs2, hid2, params, hidden_dim=hidden_dim,
                               compute_dtype=jnp.float32)

    out2, _ = mixnet_forward(q2, obs2, hid2, params, hidden_dim=hidden_dim,
                             compute_dtype=jnp.float32)          # TB=160, grid=(2,), ragged tail
    out2 = jax.block_until_ready(out2)
    assert out2.shape == (B2, 1)
    assert bool(jnp.isfinite(out2).all())
    assert jnp.allclose(out2, ref2, atol=1e-3, rtol=1e-3)

    out3, _ = mixnet_forward(q2, obs2, hid2, params, hidden_dim=hidden_dim,
                             compute_dtype=jnp.float32, batch_tile=64)  # grid=(5,), ragged tail
    out3 = jax.block_until_ready(out3)
    assert bool(jnp.isfinite(out3).all())
    assert jnp.allclose(out3, ref2, atol=1e-3, rtol=1e-3)

    print("KERNEL_OK")
</pallas_src>

<mosaic_0001>
module attributes {stable_mosaic.version = 11 : i64} {
  func.func @mixnet_kernel(%arg0: i32, %arg1: memref<32x64xf32, #tpu.memory_space<vmem>>, %arg2: memref<32x4xf32, #tpu.memory_space<vmem>>, %arg3: memref<64x256xf32, #tpu.memory_space<vmem>>, %arg4: memref<1x256xf32, #tpu.memory_space<vmem>>, %arg5: memref<4x128xf32, #tpu.memory_space<vmem>>, %arg6: memref<1x32xf32, #tpu.memory_space<vmem>>, %arg7: memref<1x1xf32, #tpu.memory_space<smem>>, %arg8: memref<32x1xf32, #tpu.memory_space<vmem>>) attributes {dimension_semantics = [#tpu.dimension_semantics<parallel>], iteration_bounds = array<i64: 1>, scalar_prefetch = 0 : i64, scratch_operands = 0 : i64, tpu.core_type = #tpu.core_type<tc>, window_params = [{transform_indices = @transform_0, window_bounds = array<i64: 32, 64>}, {transform_indices = @transform_1, window_bounds = array<i64: 32, 4>}, {pipeline_mode = #tpu.pipeline_mode<synchronous>, transform_indices = @transform_2, window_bounds = array<i64: 64, 256>}, {pipeline_mode = #tpu.pipeline_mode<synchronous>, transform_indices = @transform_3, window_bounds = array<i64: 1, 256>}, {pipeline_mode = #tpu.pipeline_mode<synchronous>, transform_indices = @transform_4, window_bounds = array<i64: 4, 128>}, {pipeline_mode = #tpu.pipeline_mode<synchronous>, transform_indices = @transform_5, window_bounds = array<i64: 1, 32>}, {transform_indices = @transform_6, window_bounds = array<i64: 1, 1>}, {transform_indices = @transform_7, window_bounds = array<i64: 32, 1>}]} {
    %c0 = arith.constant 0 : index
    %c0_0 = arith.constant 0 : index
    %0 = vector.load %arg1[%c0, %c0_0] : memref<32x64xf32, #tpu.memory_space<vmem>>, vector<32x64xf32>
    %c0_1 = arith.constant 0 : index
    %c0_2 = arith.constant 0 : index
    %1 = vector.load %arg2[%c0_1, %c0_2] : memref<32x4xf32, #tpu.memory_space<vmem>>, vector<32x4xf32>
    %c0_3 = arith.constant 0 : index
    %c0_4 = arith.constant 0 : index
    %2 = vector.load %arg3[%c0_3, %c0_4] : memref<64x256xf32, #tpu.memory_space<vmem>>, vector<64x256xf32>
    %cst = arith.constant dense<0.000000e+00> : vector<32x256xf32>
    %3 = tpu.matmul %0, %2, %cst {dimension_numbers = #tpu.dot_dimension_numbers<[1], [0], [0], [1], [0, 0, 1, 1], [], []>} : vector<32x64xf32>, vector<64x256xf32>, vector<32x256xf32> -> vector<32x256xf32>
    %c0_5 = arith.constant 0 : index
    %c0_6 = arith.constant 0 : index
    %4 = vector.load %arg4[%c0_5, %c0_6] : memref<1x256xf32, #tpu.memory_space<vmem>>, vector<1x256xf32>
    %5 = vector.broadcast %4 : vector<1x256xf32> to vector<32x256xf32>
    %6 = arith.addf %3, %5 : vector<32x256xf32>
    %7 = vector.extract_strided_slice %6 {offsets = [0, 0], sizes = [32, 128], strides = [1, 1]} : vector<32x256xf32> to vector<32x128xf32>
    %8 = math.absf %7 : vector<32x128xf32>
    %9 = vector.extract_strided_slice %6 {offsets = [0, 128], sizes = [32, 32], strides = [1, 1]} : vector<32x256xf32> to vector<32x32xf32>
    %10 = vector.extract_strided_slice %6 {offsets = [0, 160], sizes = [32, 32], strides = [1, 1]} : vector<32x256xf32> to vector<32x32xf32>
    %11 = math.absf %10 : vector<32x32xf32>
    %12 = vector.extract_strided_slice %6 {offsets = [0, 192], sizes = [32, 32], strides = [1, 1]} : vector<32x256xf32> to vector<32x32xf32>
    %cst_7 = arith.constant 0.000000e+00 : f32
    %13 = vector.broadcast %cst_7 : f32 to vector<32x32xf32>
    %14 = arith.maximumf %12, %13 : vector<32x32xf32>
    %c0_8 = arith.constant 0 : index
    %c0_9 = arith.constant 0 : index
    %15 = vector.load %arg5[%c0_8, %c0_9] : memref<4x128xf32, #tpu.memory_space<vmem>>, vector<4x128xf32>
    %cst_10 = arith.constant dense<0.000000e+00> : vector<32x128xf32>
    %16 = tpu.matmul %1, %15, %cst_10 {dimension_numbers = #tpu.dot_dimension_numbers<[1], [0], [0], [1], [0, 0, 1, 1], [], []>} : vector<32x4xf32>, vector<4x128xf32>, vector<32x128xf32> -> vector<32x128xf32>
    %17 = arith.mulf %8, %16 : vector<32x128xf32>
    %18 = vector.extract_strided_slice %17 {offsets = [0, 0], sizes = [32, 32], strides = [1, 1]} : vector<32x128xf32> to vector<32x32xf32>
    %19 = arith.addf %9, %18 : vector<32x32xf32>
    %20 = vector.extract_strided_slice %17 {offsets = [0, 32], sizes = [32, 32], strides = [1, 1]} : vector<32x128xf32> to vector<32x32xf32>
    %21 = arith.addf %19, %20 : vector<32x32xf32>
    %22 = vector.extract_strided_slice %17 {offsets = [0, 64], sizes = [32, 32], strides = [1, 1]} : vector<32x128xf32> to vector<32x32xf32>
    %23 = arith.addf %21, %22 : vector<32x32xf32>
    %24 = vector.extract_strided_slice %17 {offsets = [0, 96], sizes = [32, 32], strides = [1, 1]} : vector<32x128xf32> to vector<32x32xf32>
    %25 = arith.addf %23, %24 : vector<32x32xf32>
    %cst_11 = arith.constant 0.000000e+00 : f32
    %26 = vector.broadcast %cst_11 : f32 to vector<32x32xf32>
    %27 = arith.maximumf %25, %26 : vector<32x32xf32>
    %28 = arith.mulf %11, %27 : vector<32x32xf32>
    %c0_12 = arith.constant 0 : index
    %c0_13 = arith.constant 0 : index
    %29 = vector.load %arg6[%c0_12, %c0_13] : memref<1x32xf32, #tpu.memory_space<vmem>>, vector<1x32xf32>
    %30 = vector.broadcast %29 : vector<1x32xf32> to vector<32x32xf32>
    %31 = arith.mulf %14, %30 : vector<32x32xf32>
    %32 = arith.addf %28, %31 : vector<32x32xf32>
    %cst_14 = arith.constant dense<0.000000e+00> : vector<32xf32>
    %33 = vector.multi_reduction <add>, %32, %cst_14 [1] : vector<32x32xf32> to vector<32xf32>
    %34 = vector.shape_cast %33 : vector<32xf32> to vector<32x1xf32>
    %c0_15 = arith.constant 0 : index
    %c0_16 = arith.constant 0 : index
    %35 = memref.load %arg7[%c0_15, %c0_16] : memref<1x1xf32, #tpu.memory_space<smem>>
    %36 = vector.broadcast %35 : f32 to vector<32x1xf32>
    %37 = arith.addf %34, %36 : vector<32x1xf32>
    %c0_17 = arith.constant 0 : index
    %c0_18 = arith.constant 0 : index
    %38 = vector.load %arg8[%c0_17, %c0_18] : memref<32x1xf32, #tpu.memory_space<vmem>>, vector<32x1xf32>
    tpu.vector_store %arg8[%c0_17, %c0_18], %37 {strides = array<i32>} : memref<32x1xf32, #tpu.memory_space<vmem>>, vector<32x1xf32>,
    return
  }
  func.func @transform_0(%arg0: i32) -> (i32, i32) {
    %c0_i32 = arith.constant 0 : i32
    %c0_i32_0 = arith.constant 0 : i32
    return %arg0, %c0_i32 : i32, i32
  }
  func.func @transform_1(%arg0: i32) -> (i32, i32) {
    %c0_i32 = arith.constant 0 : i32
    %c0_i32_0 = arith.constant 0 : i32
    return %arg0, %c0_i32 : i32, i32
  }
  func.func @transform_2(%arg0: i32) -> (i32, i32) {
    %c0_i32 = arith.constant 0 : i32
    %c0_i32_0 = arith.constant 0 : i32
    %c0_i32_1 = arith.constant 0 : i32
    return %c0_i32, %c0_i32_0 : i32, i32
  }
  func.func @transform_3(%arg0: i32) -> (i32, i32) {
    %c0_i32 = arith.constant 0 : i32
    %c0_i32_0 = arith.constant 0 : i32
    %c0_i32_1 = arith.constant 0 : i32
    return %c0_i32, %c0_i32_0 : i32, i32
  }
  func.func @transform_4(%arg0: i32) -> (i32, i32) {
    %c0_i32 = arith.constant 0 : i32
    %c0_i32_0 = arith.constant 0 : i32
    %c0_i32_1 = arith.constant 0 : i32
    return %c0_i32, %c0_i32_0 : i32, i32
  }
  func.func @transform_5(%arg0: i32) -> (i32, i32) {
    %c0_i32 = arith.constant 0 : i32
    %c0_i32_0 = arith.constant 0 : i32
    %c0_i32_1 = arith.constant 0 : i32
    return %c0_i32, %c0_i32_0 : i32, i32
  }
  func.func @transform_6(%arg0: i32) -> (i32, i32) {
    %c0_i32 = arith.constant 0 : i32
    %c0_i32_0 = arith.constant 0 : i32
    %c0_i32_1 = arith.constant 0 : i32
    return %c0_i32, %c0_i32_0 : i32, i32
  }
  func.func @transform_7(%arg0: i32) -> (i32, i32) {
    %c0_i32 = arith.constant 0 : i32
    %c0_i32_0 = arith.constant 0 : i32
    return %arg0, %c0_i32 : i32, i32
  }
}

</mosaic_0001>

<bundles_post_ra>
// kernel: tpu_custom_call.1
= control target key start
LH: loop header
LB: loop body
LE: loop exit
PB: predicated region body
PF: predicated region fallthrough
CT: control target
= control target key end

     0   :  { %13 = vsyncpa [#allocation4], 0  ;;  %s765_s0 = inlined_call_operand.vmem [shape: f32[2,64], index: 0, kind: input, shape index: {}]   ;;  %s766_s1 = inlined_call_operand.hbm [shape: f32[2,4], index: 1, kind: input, shape index: {}]   ;;  %s767_s2 = inlined_call_operand.hbm [shape: f32[64,256], index: 2, kind: input, shape index: {}]   ;;  %s768_s3 = inlined_call_operand.vmem [shape: f32[1,256], index: 3, kind: input, shape index: {}]   ;;  %s769_s4 = inlined_call_operand.vmem [shape: f32[4,128], index: 4, kind: input, shape index: {}]   ;;  %s770_s5 = inlined_call_operand.vmem [shape: f32[1,32], index: 5, kind: input, shape index: {}]   ;;  %s771_s6 = inlined_call_operand.<no memory space> [shape: f32[1,1], index: 6, kind: input, shape index: {}]   ;;  %s772_s7 = inlined_call_operand.vmem [shape: f32[2,1], index: 7, kind: output, shape index: {}]  }
   0x1   :  { %14 = vsyncpa [#allocation6], 0 }
   0x2   :  { %21 = vsyncadd [#allocation4], 480  ;;  %s610_s24 = smov [#allocation3]   ;;  %s562_s28 = scalar_lea.hbm %s766_s1, 32 }
   0x3   :  { %s22_s25 = sshll.u32 %s610_s24, 4  ;;  %p563_p0 = scmp.ne.s32.totalorder %s766_s1, %s562_s28  ;;  %s23_s25 = int_to_ptr.vmem [resolvable:$true] %s22_s25 }
   0x4   :  { %p566_p1 = scmp.lt.u32.totalorder %s562_s28, %s766_s1 }
   0x6   :  { %p568_p2 = pnand %p566_p1, %p563_p0 }
   0x8   :  { %571 = shalt.err (!%p568_p2)
}
   0x9   :  { %s572_s10 = scalar_lea.vmem %s23_s25, 32  ;;  %s576_s11 = scalar_lea.vmem %s23_s25, 512 }
   0xa   :  { %p573_p3 = scmp.ne.s32.totalorder %s23_s25, %s572_s10  ;;  %p577_p4 = scmp.lt.s32.totalorder %s23_s25, %s23_s25 }
   0xb   :  { %p578_p5 = scmp.lt.s32.totalorder %s576_s11, %s572_s10 }
   0xd   :  { %p579_p6 = por %p578_p5, %p577_p4 }
   0xf   :  { %p580_p7 = pnand %p579_p6, %p573_p3 }
  0x11   :  { %583 = shalt.err (!%p580_p7)
}
  0x12   :  { %s611_s12 = smov 32   ;;  %s612_s13 = smov 2  }
  0x13   :  { %28 = dma.hbm_to_vmem [thread:$0]  %s766_s1, 32, %s23_s25, [#allocation4], %s611_s12, %s611_s12, %s612_s13  }
  0x14   :  { %s613_s16 = smov [#allocation5]   ;;  %s584_s20 = scalar_lea.hbm %s767_s2, 2048 }
  0x15   :  { %s34_s17 = sshll.u32 %s613_s16, 4  ;;  %p585_p8 = scmp.ne.s32.totalorder %s767_s2, %s584_s20  ;;  %s35_s17 = int_to_ptr.vmem [resolvable:$true] %s34_s17 }
  0x16   :  { %p588_p9 = scmp.lt.u32.totalorder %s584_s20, %s767_s2 }
  0x18   :  { %p590_p10 = pnand %p588_p9, %p585_p8 }
  0x1a   :  { %593 = shalt.err (!%p590_p10)
}
  0x1b   :  { %s594_s26 = scalar_lea.vmem %s35_s17, 2048  ;;  %p599_p12 = scmp.lt.s32.totalorder %s35_s17, %s35_s17 }
  0x1c   :  { %p595_p11 = scmp.ne.s32.totalorder %s35_s17, %s594_s26  ;;  %p600_p13 = scmp.lt.s32.totalorder %s594_s26, %s594_s26 }
  0x1e   :  { %p601_p0 = por %p600_p13, %p599_p12 }
  0x20   :  { %p602_p1 = pnand %p601_p0, %p595_p11 }
  0x22   :  { %605 = shalt.err (!%p602_p1)
}
  0x23   :  { %s614_s1 = smov 256   ;;  %s615_s25 = smov 16  }
  0x24   :  { %40 = dma.hbm_to_vmem [thread:$0]  %s767_s2, 2048, %s35_s17, [#allocation6], %s614_s1, %s614_s1, %s615_s25  }
  0x25   :  { %606 = dma.done.wait [#allocation4], 512  }
  0x26   :  { %607 = vsyncadd [#allocation4], 4294966784 }
  0x27   :  { %608 = dma.done.wait [#allocation6], 2048  }
  0x28   :  { %609 = vsyncadd [#allocation6], 4294965248  ;;  %v616_v0 = vmov 0.0   ;;  %v64_v1 = vld [vmem:[#allocation5 + $0x8] sm:$0xff]  ;;  %v66_v2 = vld [vmem:[#allocation5 + $0x18] sm:$0xff]  ;;  %s617_s30 = smov 64   ;;  %v81_v35 = vlaneseq }
  0x29   :  { %168 = vmatprep.mubr.f32.mxu0 %v616_v0  ;;  %186 = vmatprep.mubr.f32.mxu1 %v616_v0  ;;  %v63_v3 = vld [vmem:[#allocation5] sm:$0xff]  ;;  %v529_v4 = vpack.c.bf16 %v66_v2, %v64_v1  ;;  %v65_v5 = vld [vmem:[#allocation5 + $0x10] sm:$0xff]  ;;  %v68_v6 = vld [vmem:[#allocation5 + $0x28] sm:$0xff]  ;;  %vm219_vm0 = vcmask 1043456   ;;  %vm91_vm1 = vcmask 523264   ;;  %vm206_vm2 = vcmask 31744  }
  0x2a   :  { %v70_v7 = vld [vmem:[#allocation5 + $0x38] sm:$0xff]  ;;  %v531_v8 = vpack.c.bf16 %v65_v5, %v63_v3  ;;  %v67_v10 = vld [vmem:[#allocation5 + $0x20] sm:$0xff]  ;;  %v69_v11 = vld [vmem:[#allocation5 + $0x30] sm:$0xff]  ;;  %v82_v36 = vshrl.u32 %v81_v35, 7  ;;  %vm441_vm3 = vcmask 261120   ;;  %vm460_vm4 = vcmask 7168  }
  0x2b   :  { %v533_v9 = vpack.c.bf16 %v70_v7, %v68_v6  ;;  %v72_v12 = vld [vmem:[#allocation5 + $0x48] sm:$0xff]  ;;  %530 = vmatprep.subr.bf16.mxu0 %v529_v4  ;;  %545 = vmatprep.subr.bf16.mxu1 %v529_v4  ;;  %v74_v13 = vld [vmem:[#allocation5 + $0x58] sm:$0xff]  ;;  %v535_v14 = vpack.c.bf16 %v69_v11, %v67_v10  ;;  %v71_v16 = vld [vmem:[#allocation5 + $0x40] sm:$0xff] }
  0x2c   :  { %532 = vmatpush1.bf16.msra.mxu0 %v531_v8  ;;  %549 = vmatpush1.bf16.msra.mxu1 %v531_v8  ;;  %v537_v15 = vpack.c.bf16 %v74_v13, %v72_v12  ;;  %v73_v17 = vld [vmem:[#allocation5 + $0x50] sm:$0xff]  ;;  %v76_v18 = vld [vmem:[#allocation5 + $0x68] sm:$0xff]  ;;  %v78_v19 = vld [vmem:[#allocation5 + $0x78] sm:$0xff]  ;;  %v83_v37 = vsub.s32 0, %v82_v36  ;;  %v87_v39 = vsub.s32 1, %v82_v36 }
  0x2d   :  { %534 = vmatprep.subr.bf16.mxu0 %v533_v9  ;;  %546 = vmatprep.subr.bf16.mxu1 %v533_v9  ;;  %v539_v20 = vpack.c.bf16 %v73_v17, %v71_v16  ;;  %v515_v21 = vld [vmem:[%s770_s5] ss:$0 sm:$0xff]  ;;  %v541_v22 = vpack.c.bf16 %v78_v19, %v76_v18  ;;  %v77_v24 = vld [vmem:[#allocation5 + $0x70] sm:$0xff]  ;;  %v58_v28 = vld [vmem:[%s765_s0 + $0x18] sm:$0xff] }
  0x2e   :  { %v75_v23 = vld [vmem:[#allocation5 + $0x60] sm:$0xff]  ;;  %398 = vrot.lane.b32.xlu0 %v515_v21, %s617_s30  ;;  %v56_v30 = vld [vmem:[%s765_s0 + $0x8] sm:$0xff]  ;;  %v61_v32 = vld [vmem:[#allocation3 + $0x10] sm:$0xff] }
  0x2f   :  { %v543_v25 = vpack.c.bf16 %v77_v24, %v75_v23  ;;  %v205_v26 = vld [vmem:[%s769_s4] sm:$0xf]  ;;  %v60_v31 = vld [vmem:[#allocation3 + $0x8] sm:$0xff]  ;;  %v62_v33 = vld [vmem:[#allocation3 + $0x18] sm:$0xff] }
  0x30   :  { %536 = vmatpush1.bf16.msra.mxu0 %v535_v14  ;;  %550 = vmatpush1.bf16.msra.mxu1 %v535_v14  ;;  %v55_v27 = vld [vmem:[%s765_s0] sm:$0xff]  ;;  %v57_v34 = vld [vmem:[%s765_s0 + $0x10] sm:$0xff]  ;;  %s618_s0 = smov 96  }
  0x31   :  { %538 = vmatprep.subr.bf16.mxu0 %v537_v15  ;;  %547 = vmatprep.subr.bf16.mxu1 %v537_v15  ;;  %v59_v29 = vld [vmem:[#allocation3] sm:$0xff] }
  0x32   :  { %v79_v38 = vld [vmem:[%s768_s3] sm:$0x3] }
  0x33   :  { %v84_v40 = vrot.slane %v79_v38, %v83_v37  ;;  %v88_v41 = vrot.slane %v79_v38, %v87_v39 }
  0x34   :  { %540 = vmatpush1.bf16.msra.mxu0 %v539_v20  ;;  %551 = vmatpush1.bf16.msra.mxu1 %v539_v20 }
  0x35   :  { %542 = vmatprep.subr.bf16.mxu0 %v541_v22  ;;  %548 = vmatprep.subr.bf16.mxu1 %v541_v22 }
  0x38   :  { %544 = vmatpush1.bf16.msra.mxu0 %v543_v25  ;;  %552 = vmatpush1.bf16.msra.mxu1 %v543_v25 }
  0x39   :  { %521 = vmatprep.subr.msk.mxu1 %vm219_vm0, %v205_v26 }
  0x3b   :  { %506 = vmatmul.mubr.msk.f32.vlgmr.msra.gmra.mrb[0].mxu0 %vm91_vm1, %v55_v27  ;;  %509 = vmatmul.mubr.msk.f32.vlgmr.msra.gmra.mrb[0].mxu1 %vm91_vm1, %v58_v28 }
  0x3c   :  { %522 = vmatpush3.msk.msra.mxu1 %vm219_vm0, %v205_v26  ;;  %174 = vmatprep.mubr.f32.mxu0 %v616_v0 }
  0x3d   :  { %523 = vmatprep.mubr.msk.f32.mxu1 %vm206_vm2, %v59_v29 }
  0x3f   :  { %507 = vmatmul.mubr.msk.f32.gmra.mrb[2].mxu0 %vm91_vm1, %v56_v30  ;;  %524 = vmatmul.mubr.msk.f32.vlgmr.msra.gmra.mrb[2].mxu1 %vm206_vm2, %v60_v31 }
  0x40   :  { %526 = vmatprep.mubr.msk.f32.mxu1 %vm206_vm2, %v61_v32  ;;  %180 = vmatprep.mubr.f32.mxu0 %v616_v0 }
  0x43   :  { %527 = vmatmul.mubr.msk.f32.gmra.mrb[4].mxu1 %vm206_vm2, %v62_v33  ;;  %508 = vmatmul.mubr.msk.f32.gmra.mrb[4].mxu0 %vm91_vm1, %v57_v34 }
  0xa0   :  { %v399_v11 = vpop.permute.xlu0 %398 }
 0x10e   :  { %v188_v42 = vpop.f32.mrb[0].mxu1  ;;  %v170_v43 = vpop.f32.mrb[0].mxu0 }
 0x10f   :  { %v171_v44 = vadd.f32 %v170_v43, %v84_v40  ;;  %v190_v45 = vpop.f32.mrb[1].mxu1  ;;  %v172_v46 = vpop.f32.mrb[1].mxu0  ;;  %v189_v48 = vadd.f32 %v188_v42, %v84_v40 }
 0x110   :  { %v715_v47 = vadd.f32 %v190_v45, %v88_v41  ;;  %v717_v55 = vadd.f32 %v172_v46, %v88_v41 }
 0x111   :  { %v193_v49 = vand.u32 2147483647, %v171_v44  ;;  %v196_v57 = vand.u32 2147483647, %v189_v48 }
 0x112   :  { %v176_v50 = vpop.f32.mrb[2].mxu0  ;;  %v525_v51 = vpop.f32.mrb[2].mxu1  ;;  %v201_v10 = vmax.f32 %v717_v55, 0.0  ;;  %v197_v48 = vand.u32 2147483647, %v717_v55 }
 0x113   :  { %v177_v52 = vadd.f32 %v176_v50, %v84_v40  ;;  %v289_v53 = vpop.f32.mrb[3].mxu1  ;;  %v178_v54 = vpop.f32.mrb[3].mxu0 }
 0x114   :  { %v308_v56 = vmul.f32 %v289_v53, %v193_v49  ;;  %v722_v63 = vadd.f32 %v178_v54, %v88_v41  ;;  %v401_v13 = vmul.f32 %v399_v11, %v201_v10 }
 0x115   :  { %v194_v58 = vand.u32 2147483647, %v177_v52 }
 0x116   :  { %v528_v59 = vpop.f32.mrb[4].mxu1  ;;  %352 = vrot.lane.b32.xlu1 %v308_v56, %s611_s12  ;;  %320 = vrot.lane.b32.xlu0 %v308_v56, %s618_s0  ;;  %v182_v60 = vpop.f32.mrb[4].mxu0  ;;  %v312_v61 = vadd.f32 %v308_v56, %v717_v55  ;;  %v202_v12 = vmax.f32 %v722_v63, 0.0  ;;  %v198_v53 = vand.u32 2147483647, %v722_v63 }
 0x117   :  { %v309_v62 = vmul.f32 %v525_v51, %v194_v58  ;;  %v311_v0 = vmul.f32 %v528_v59, %v196_v57  ;;  %v183_v1 = vadd.f32 %v182_v60, %v84_v40  ;;  %v184_v2 = vpop.f32.mrb[5].mxu0  ;;  %v299_v3 = vpop.f32.mrb[5].mxu1  ;;  %v200_v55 = vand.u32 2147483647, %v715_v47 }
 0x118   :  { %v724_v4 = vadd.f32 %v184_v2, %v88_v41  ;;  %v402_v14 = vmul.f32 %v399_v11, %v202_v12  ;;  %v204_v41 = vmax.f32 %v715_v47, 0.0 }
 0x119   :  { %v195_v5 = vand.u32 2147483647, %v183_v1  ;;  %v313_v6 = vadd.f32 %v309_v62, %v722_v63  ;;  %v315_v7 = vadd.f32 %v311_v0, %v715_v47 }
 0x11a   :  { %322 = vrot.lane.b32.xlu1 %v309_v62, %s618_s0  ;;  %336 = vrot.lane.b32.xlu0 %v308_v56, %s617_s30  ;;  %v203_v42 = vmax.f32 %v724_v4, 0.0  ;;  %v404_v45 = vmul.f32 %v399_v11, %v204_v41 }
 0x11b   :  { %v310_v8 = vmul.f32 %v299_v3, %v195_v5 }
 0x11c   :  { %v403_v46 = vmul.f32 %v399_v11, %v203_v42  ;;  %v455_v11 = vstv %s771_s6 }
 0x11d   :  { %v314_v9 = vadd.f32 %v310_v8, %v724_v4 }
 0x11e   :  { %326 = vrot.lane.b32.xlu1 %v311_v0, %s618_s0  ;;  %354 = vrot.lane.b32.xlu0 %v309_v62, %s611_s12 }
 0x122   :  { %338 = vrot.lane.b32.xlu1 %v309_v62, %s617_s30  ;;  %324 = vrot.lane.b32.xlu0 %v310_v8, %s618_s0 }
 0x126   :  { %342 = vrot.lane.b32.xlu1 %v311_v0, %s617_s30  ;;  %340 = vrot.lane.b32.xlu0 %v310_v8, %s617_s30 }
 0x12a   :  { %356 = vrot.lane.b32.xlu1 %v310_v8, %s611_s12  ;;  %358 = vrot.lane.b32.xlu0 %v311_v0, %s611_s12 }
 0x12e   :  { %409 = vrot.lane.b32.xlu0 %v401_v13, %s618_s0 }
 0x132   :  { %411 = vrot.lane.b32.xlu0 %v402_v14, %s618_s0 }
 0x188   :  { %v353_v15 = vpop.permute.xlu1 %352  ;;  %v321_v16 = vpop.permute.xlu0 %320 }
 0x189   :  { %v332_v17 = vadd.f32 %v321_v16, %v312_v61  ;;  %v199_v61 = vand.u32 2147483647, %v724_v4 }
 0x18c   :  { %v323_v18 = vpop.permute.xlu1 %322  ;;  %v337_v19 = vpop.permute.xlu0 %336 }
 0x18d   :  { %v348_v20 = vadd.f32 %v337_v19, %v332_v17  ;;  %v333_v25 = vadd.f32 %v323_v18, %v313_v6 }
 0x18f   :  { %v364_v21 = vadd.f32 %v353_v15, %v348_v20 }
 0x190   :  { %v327_v22 = vpop.permute.xlu1 %326  ;;  %v355_v23 = vpop.permute.xlu0 %354 }
 0x191   :  { %v368_v24 = vmax.f32 %v364_v21, 0.0  ;;  %v335_v32 = vadd.f32 %v327_v22, %v315_v7 }
 0x193   :  { %376 = vrot.lane.b32.xlu1 %v368_v24, %s611_s12 }
 0x194   :  { %v339_v26 = vpop.permute.xlu1 %338  ;;  %v325_v27 = vpop.permute.xlu0 %324 }
 0x195   :  { %v349_v28 = vadd.f32 %v339_v26, %v333_v25  ;;  %v334_v33 = vadd.f32 %v325_v27, %v314_v9 }
 0x197   :  { %v365_v29 = vadd.f32 %v355_v23, %v349_v28 }
 0x198   :  { %v343_v30 = vpop.permute.xlu1 %342  ;;  %v341_v31 = vpop.permute.xlu0 %340 }
 0x199   :  { %v369_v34 = vmax.f32 %v365_v29, 0.0  ;;  %v351_v35 = vadd.f32 %v343_v30, %v335_v32  ;;  %v350_v36 = vadd.f32 %v341_v31, %v334_v33 }
 0x19b   :  { %378 = vrot.lane.b32.xlu1 %v369_v34, %s611_s12 }
 0x19c   :  { %v357_v37 = vpop.permute.xlu1 %356  ;;  %v359_v38 = vpop.permute.xlu0 %358 }
 0x19d   :  { %v366_v39 = vadd.f32 %v357_v37, %v350_v36  ;;  %v367_v40 = vadd.f32 %v359_v38, %v351_v35 }
 0x19f   :  { %v370_v43 = vmax.f32 %v366_v39, 0.0  ;;  %v371_v44 = vmax.f32 %v367_v40, 0.0 }
 0x1a0   :  { %v410_v51 = vpop.permute.xlu0 %409 }
 0x1a1   :  { %380 = vrot.lane.b32.xlu0 %v370_v43, %s611_s12  ;;  %382 = vrot.lane.b32.xlu1 %v371_v44, %s611_s12 }
 0x1a4   :  { %v412_v57 = vpop.permute.xlu0 %411 }
 0x1a5   :  { %415 = vrot.lane.b32.xlu0 %v404_v45, %s618_s0  ;;  %413 = vrot.lane.b32.xlu1 %v403_v46, %s618_s0 }
 0x205   :  { %v377_v49 = vpop.permute.xlu1 %376 }
 0x206   :  { %v388_v50 = vmul.f32 %v377_v49, %v197_v48 }
 0x208   :  { %v421_v52 = vadd.f32 %v410_v51, %v388_v50 }
 0x20a   :  { %429 = vrot.lane.b32.xlu1 %v421_v52, %s618_s0 }
 0x20d   :  { %v379_v54 = vpop.permute.xlu1 %378 }
 0x20e   :  { %v389_v56 = vmul.f32 %v379_v54, %v198_v53 }
 0x210   :  { %v422_v58 = vadd.f32 %v412_v57, %v389_v56 }
 0x212   :  { %431 = vrot.lane.b32.xlu0 %v422_v58, %s618_s0 }
 0x213   :  { %v381_v59 = vpop.permute.xlu0 %380  ;;  %v383_v60 = vpop.permute.xlu1 %382 }
 0x214   :  { %v390_v62 = vmul.f32 %v381_v59, %v199_v61  ;;  %v391_v0 = vmul.f32 %v383_v60, %v200_v55 }
 0x217   :  { %v416_v1 = vpop.permute.xlu0 %415  ;;  %v414_v2 = vpop.permute.xlu1 %413 }
 0x218   :  { %v424_v3 = vadd.f32 %v416_v1, %v391_v0  ;;  %v423_v5 = vadd.f32 %v414_v2, %v390_v62 }
 0x21a   :  { %435 = vrot.lane.b32.xlu0 %v424_v3, %s618_s0  ;;  %433 = vrot.lane.b32.xlu1 %v423_v5, %s618_s0 }
 0x27c   :  { %v430_v63 = vpop.permute.xlu1 %429 }
 0x27d   :  { %v442_v6 = vsel %vm441_vm3, %v430_v63, 0.0 }
 0x27e   :  { %443 = vadd.xlane.f32.xlu1 %v442_v6 }
 0x284   :  { %v432_v7 = vpop.permute.xlu0 %431 }
 0x285   :  { %v445_v8 = vsel %vm441_vm3, %v432_v7, 0.0 }
 0x286   :  { %446 = vadd.xlane.f32.xlu0 %v445_v8 }
 0x28c   :  { %v436_v4 = vpop.permute.xlu0 %435  ;;  %v434_v9 = vpop.permute.xlu1 %433 }
 0x28d   :  { %v451_v47 = vsel %vm441_vm3, %v436_v4, 0.0  ;;  %v448_v10 = vsel %vm441_vm3, %v434_v9, 0.0 }
 0x28e   :  { %452 = vadd.xlane.f32.xlu1 %v451_v47  ;;  %449 = vadd.xlane.f32.xlu0 %v448_v10 }
 0x30b   :  { %v444_v12 = vpop.xlane.xlu1 %443 }
 0x30c   :  { %v456_v13 = vadd.f32 %v455_v11, %v444_v12 }
 0x30e   :  { %461 = vst.msk [vmem:[#allocation7] sm:$0xff] %vm460_vm4, %v456_v13 }
 0x313   :  { %v447_v14 = vpop.xlane.xlu0 %446 }
 0x315   :  { %v482_v15 = vld [vmem:[#allocation7] sm:$0x3] }
 0x316   :  { %483 = vst [vmem:[%s772_s7] sm:$0x3] %v482_v15 }
 0x31b   :  { %v450_v16 = vpop.xlane.xlu0 %449  ;;  %v453_v17 = vpop.xlane.xlu1 %452 }
 0x31c   :  { %500 = vsyncpa [#allocation4], 1 }
 0x31d   :  { %501 = vsyncpa [#allocation6], 1 }

</bundles_post_ra>
